<compile_context>
chip_gen: v7x
topology: tpu7x:2x2x1
jax: 0.10.0
libtpu: 0.0.40
codegen_flags: <defaults>
</compile_context>

<pallas_src>
import functools
import math

import jax
import jax.numpy as jnp
from jax.experimental import pallas as pl
from jax.experimental.pallas import tpu as pltpu


NEG_INF = -1e30  # finite "-inf"; all masked-softmax math stays in f32

_VMEM_LIMIT = 56 * 1024 * 1024    # raised scoped-VMEM limit; safe on v5e/v6e/v7x
_VMEM_BUDGET = 40 * 1024 * 1024   # per-kernel working-set budget (fits v7x's 64 MiB VMEM)

_SUB_TILES = (512, 256, 128, 64, 32, 16, 8)   # tm candidates (second-to-last dim)
_LANE_TILES = (512, 256, 128)                 # tn candidates (last dim)
_K_TILES = (1024, 512, 256, 128)              # tk candidates (reduction dim)


def _pick_tile(dim, candidates):
    for c in candidates:
        if dim % c == 0:
            return c
    return dim  # full dim always satisfies the (8,128) BlockSpec rule


def _mosaic(dim_sems):
    return pltpu.CompilerParams(dimension_semantics=dim_sems,
                                vmem_limit_bytes=_VMEM_LIMIT)


# ---------------------------------------------------------------------------
# Tiled linear: y = x @ W + b, K-reduction grid axis with f32 accumulator
# ---------------------------------------------------------------------------
def _matmul_bias_kernel(x_ref, w_ref, b_ref, o_ref, acc_ref, *, k_axis):
    k = pl.program_id(k_axis)

    @pl.when(k == 0)
    def _init():
        acc_ref[...] = jnp.zeros_like(acc_ref)

    acc_ref[...] += jnp.dot(x_ref[...], w_ref[...],
                            preferred_element_type=jnp.float32)

    @pl.when(k == pl.num_programs(k_axis) - 1)
    def _finalize():
        o_ref[...] = (acc_ref[...] + b_ref[...]).astype(o_ref.dtype)


def pallas_linear(x, w, b, out_dtype=None):
    """x: (M, K), w: (K, N), b: (N,) f32 -> (M, N)."""
    M, K = x.shape
    N = w.shape[1]
    out_dtype = out_dtype or x.dtype
    tm = _pick_tile(M, _SUB_TILES)
    tn = _pick_tile(N, _LANE_TILES)
    tk = _pick_tile(K, _K_TILES)
    grid = (M // tm, N // tn, K // tk)
    return pl.pallas_call(
        functools.partial(_matmul_bias_kernel, k_axis=2),
        out_shape=jax.ShapeDtypeStruct((M, N), out_dtype),
        grid=grid,
        in_specs=[
            pl.BlockSpec((tm, tk), lambda i, j, k: (i, k)),
            pl.BlockSpec((tk, tn), lambda i, j, k: (k, j)),
            pl.BlockSpec((1, tn), lambda i, j, k: (0, j)),
        ],
        out_specs=pl.BlockSpec((tm, tn), lambda i, j, k: (i, j)),
        scratch_shapes=[pltpu.VMEM((tm, tn), jnp.float32)],
        compiler_params=_mosaic(("parallel", "parallel", "arbitrary")),
    )(x, w, b.reshape(1, N))


def pallas_qkv_proj(x, w3, b3, out_dtype=None):
    """x: (M, K), w3: (3, K, N), b3: (3, N) f32 -> (3, M, N).

    Single launch producing Q/K/V stacked on a leading axis, in exactly the layout the
    attention kernel indexes (no HBM transpose/slice of activations afterwards).
    """
    M, K = x.shape
    N = w3.shape[2]
    out_dtype = out_dtype or x.dtype
    tm = _pick_tile(M, _SUB_TILES)
    tn = _pick_tile(N, _LANE_TILES)
    tk = _pick_tile(K, _K_TILES)
    grid = (3, M // tm, N // tn, K // tk)
    return pl.pallas_call(
        functools.partial(_matmul_bias_kernel, k_axis=3),
        out_shape=jax.ShapeDtypeStruct((3, M, N), out_dtype),
        grid=grid,
        in_specs=[
            pl.BlockSpec((tm, tk), lambda s, i, j, k: (i, k)),
            pl.BlockSpec((None, tk, tn), lambda s, i, j, k: (s, k, j)),
            pl.BlockSpec((None, 1, tn), lambda s, i, j, k: (s, 0, j)),
        ],
        out_specs=pl.BlockSpec((None, tm, tn), lambda s, i, j, k: (s, i, j)),
        scratch_shapes=[pltpu.VMEM((tm, tn), jnp.float32)],
        compiler_params=_mosaic(("parallel", "parallel", "parallel", "arbitrary")),
    )(x, w3, b3.reshape(3, 1, N))


# ---------------------------------------------------------------------------
# Flash-style causal multi-head attention, packed lower-triangular grid
# ---------------------------------------------------------------------------
def _attn_tile(S, d_out, block, itemsize):
    """Largest kv/q tile that divides S, respects `block` and the VMEM budget."""
    for t in (512, 256, 128, 64, 32, 16, 8):
        if t > block or S % t != 0:
            continue
        # 3 inputs x 2 bufs + output x 2 bufs (qkv dtype) + f32 acc, per (t, d_out) slab.
        footprint = t * d_out * (8 * itemsize + 4)
        if footprint <= _VMEM_BUDGET:
            return t
    # TODO(synk): for long S not divisible by any candidate this falls back to one full-S
    # block, which can exceed the v7x VMEM budget; padding S would be needed to avoid it.
    return S


def _lower_tri_tables(n_tiles):
    """Packed (qi, ki) schedule over the causal lower triangle, ki fastest."""
    qis, kis = [], []
    for q in range(n_tiles):
        for k in range(q + 1):
            qis.append(q)
            kis.append(k)
    return jnp.asarray(qis, jnp.int32), jnp.asarray(kis, jnp.int32)


def _flash_mha_kernel(qi_tbl, ki_tbl, q_ref, k_ref, v_ref, o_ref,
                      m_sc, l_sc, acc_sc, *, num_heads, head_dim):
    step = pl.program_id(1)
    qi = qi_tbl[step]
    ki = ki_tbl[step]
    tq = q_ref.shape[0]
    tkv = k_ref.shape[0]

    @pl.when(ki == 0)
    def _init():
        m_sc[...] = jnp.full_like(m_sc, NEG_INF)
        l_sc[...] = jnp.zeros_like(l_sc)
        acc_sc[...] = jnp.zeros_like(acc_sc)

    def _attend(masked):
        # Q already carries the 1/sqrt(head_dim) scale (folded into the QKV projection).
        q = q_ref[...]
        k = k_ref[...]
        v = v_ref[...]
        if masked:  # only diagonal tiles build/apply the causal mask
            row = jax.lax.broadcasted_iota(jnp.int32, (tq, tkv), 0)
            col = jax.lax.broadcasted_iota(jnp.int32, (tq, tkv), 1)
            allowed = row >= col
        for h in range(num_heads):  # static unroll; plain 2-D MXU dots per head
            sl = slice(h * head_dim, (h + 1) * head_dim)
            s = jax.lax.dot_general(
                q[:, sl], k[:, sl], (((1,), (1,)), ((), ())),
                preferred_element_type=jnp.float32)
            if masked:
                s = jnp.where(allowed, s, NEG_INF)
            m_prev = m_sc[:, h:h + 1]
            m_new = jnp.maximum(m_prev, jnp.max(s, axis=-1, keepdims=True))
            alpha = jnp.exp(m_prev - m_new)
            p = jnp.exp(s - m_new)
            l_sc[:, h:h + 1] = alpha * l_sc[:, h:h + 1] + jnp.sum(
                p, axis=-1, keepdims=True)
            acc_sc[:, sl] = alpha * acc_sc[:, sl] + jnp.dot(
                p.astype(v.dtype), v[:, sl], preferred_element_type=jnp.float32)
            m_sc[:, h:h + 1] = m_new

    @pl.when(ki < qi)           # interior tile: no mask work at all
    def _interior():
        _attend(masked=False)

    @pl.when(ki == qi)          # diagonal tile: mask + finalize (last kv tile of this row)
    def _diag_and_finalize():
        _attend(masked=True)
        inv_l = pl.reciprocal(l_sc[...], approx=True)   # (tq, H), EUP slot
        for h in range(num_heads):
            sl = slice(h * head_dim, (h + 1) * head_dim)
            o_ref[:, sl] = (acc_sc[:, sl] * inv_l[:, h:h + 1]).astype(o_ref.dtype)


def pallas_flash_mha(qkv, num_heads, *, block=256):
    """qkv: (3, B, S, d_out) -> causal multi-head attention context (B, S, d_out)."""
    three, B, S, d_out = qkv.shape
    assert three == 3 and d_out % num_heads == 0
    head_dim = d_out // num_heads
    t = _attn_tile(S, d_out, block, jnp.dtype(qkv.dtype).itemsize)
    n_tiles = S // t
    qi_tbl, ki_tbl = _lower_tri_tables(n_tiles)
    n_steps = int(qi_tbl.shape[0])     # n_tiles*(n_tiles+1)//2 -- no dead upper-tri steps

    blk = (None, None, t, d_out)
    # index_maps receive (grid indices..., *scalar-prefetch refs)
    q_spec = pl.BlockSpec(blk, lambda b, s, qi, ki: (0, b, qi[s], 0))
    k_spec = pl.BlockSpec(blk, lambda b, s, qi, ki: (1, b, ki[s], 0))
    v_spec = pl.BlockSpec(blk, lambda b, s, qi, ki: (2, b, ki[s], 0))
    o_spec = pl.BlockSpec((None, t, d_out), lambda b, s, qi, ki: (b, qi[s], 0))

    kernel = functools.partial(_flash_mha_kernel,
                               num_heads=num_heads, head_dim=head_dim)

    grid_spec = pltpu.PrefetchScalarGridSpec(
        num_scalar_prefetch=2,
        grid=(B, n_steps),
        in_specs=[q_spec, k_spec, v_spec],
        out_specs=o_spec,
        scratch_shapes=[
            pltpu.VMEM((t, num_heads), jnp.float32),  # running max per head
            pltpu.VMEM((t, num_heads), jnp.float32),  # running softmax denom per head
            pltpu.VMEM((t, d_out), jnp.float32),      # f32 output accumulator
        ],
    )
    return pl.pallas_call(
        kernel,
        out_shape=jax.ShapeDtypeStruct((B, S, d_out), qkv.dtype),
        grid_spec=grid_spec,
        compiler_params=_mosaic(("parallel", "arbitrary")),
    )(qi_tbl, ki_tbl, qkv, qkv, qkv)


# ---------------------------------------------------------------------------
# Module wrapper (parameters + glue; only free reshapes between kernels)
# ---------------------------------------------------------------------------
class MultiHeadAttentionPallas:
    """Pallas-TPU port of MultiHeadAttentionPyTorch (inference semantics)."""

    def __init__(self, d_in, d_out, context_length, num_heads, dropout=0.0,
                 qkv_bias=False, key=None):
        assert d_out % num_heads == 0, "d_out must be divisible by num_heads"
        self.num_heads = num_heads
        self.head_dim = d_out // num_heads
        self.d_out = d_out
        self.context_length = context_length
        # TODO(synk): training-mode dropout (dropout_p > 0) not implemented; eval semantics.
        self.dropout = dropout

        if key is None:
            key = jax.random.PRNGKey(0)
        k1, k2, k3, k4 = jax.random.split(key, 4)
        # nn.Linear(d_in, 3*d_out): weight stored pre-split as (3, d_in, d_out) (equivalent
        # parameterization; zero-cost at runtime, lets the QKV kernel emit the (3, B*S, d_out)
        # layout the attention kernel consumes directly).
        self.w_qkv = jax.random.normal(k1, (3, d_in, d_out), jnp.float32) * 0.02
        self.b_qkv = (jax.random.normal(k2, (3, d_out), jnp.float32) * 0.02
                      if qkv_bias else jnp.zeros((3, d_out), jnp.float32))
        # nn.Linear(d_out, d_out) with bias
        self.w_proj = jax.random.normal(k3, (d_out, d_out), jnp.float32) * 0.02
        self.b_proj = jax.random.normal(k4, (d_out,), jnp.float32) * 0.02

        # Kernel-side parameters: bf16 weights (MXU-native on v6e/v7x, ~2x HBM traffic cut),
        # with the softmax 1/sqrt(head_dim) scale folded into the Q projection so the attention
        # kernel never scales at runtime.  Biases stay f32 (added to the f32 accumulator).
        qscale = jnp.asarray([1.0 / math.sqrt(self.head_dim), 1.0, 1.0],
                             jnp.float32)[:, None, None]
        self._w_qkv_k = (self.w_qkv * qscale).astype(jnp.bfloat16)
        self._b_qkv_k = self.b_qkv * qscale[:, 0]
        self._w_proj_k = self.w_proj.astype(jnp.bfloat16)

    def __call__(self, x, *, attn_block=256):
        B, S, d_in = x.shape
        x2 = x.reshape(B * S, d_in).astype(jnp.bfloat16)
        qkv = pallas_qkv_proj(x2, self._w_qkv_k, self._b_qkv_k,
                              out_dtype=jnp.bfloat16)
        qkv = qkv.reshape(3, B, S, self.d_out)               # free reshape, no transpose
        ctx = pallas_flash_mha(qkv, self.num_heads, block=attn_block)   # (B, S, d_out) bf16
        out = pallas_linear(ctx.reshape(B * S, self.d_out), self._w_proj_k,
                            self.b_proj, out_dtype=jnp.float32)
        return out.reshape(B, S, self.d_out)


# ---------------------------------------------------------------------------
# Pure-JAX reference (matches scaled_dot_product_attention with is_causal=True)
# ---------------------------------------------------------------------------
def reference_forward(mod, x):
    B, S, _ = x.shape
    H, hd, d_out = mod.num_heads, mod.head_dim, mod.d_out
    q = x @ mod.w_qkv[0] + mod.b_qkv[0]
    k = x @ mod.w_qkv[1] + mod.b_qkv[1]
    v = x @ mod.w_qkv[2] + mod.b_qkv[2]
    qh = q.reshape(B, S, H, hd).transpose(0, 2, 1, 3)
    kh = k.reshape(B, S, H, hd).transpose(0, 2, 1, 3)
    vh = v.reshape(B, S, H, hd).transpose(0, 2, 1, 3)
    s = jnp.einsum("bhqd,bhkd->bhqk", qh, kh) / math.sqrt(hd)
    mask = jnp.tril(jnp.ones((S, S), dtype=bool))
    s = jnp.where(mask, s, -jnp.inf)
    p = jax.nn.softmax(s, axis=-1)
    ctx = jnp.einsum("bhqk,bhkd->bhqd", p, vh)
    ctx = ctx.transpose(0, 2, 1, 3).reshape(B, S, d_out)
    return ctx @ mod.w_proj + mod.b_proj


if __name__ == "__main__":
    # Small shapes consistent with the module's forward: (batch, seq, d_in)
    B, S, d_in, d_out, num_heads = 2, 16, 32, 32, 4
    context_length = 16

    key = jax.random.PRNGKey(0)
    kx, kp = jax.random.split(key)
    x = jax.random.normal(kx, (B, S, d_in), jnp.float32)

    mod = MultiHeadAttentionPallas(
        d_in=d_in, d_out=d_out, context_length=context_length,
        num_heads=num_heads, dropout=0.0, qkv_bias=False, key=kp,
    )

    # attn_block=8 -> a 2x2 causal tile grid packed into 3 lower-triangular steps per batch:
    # exercises the scalar-prefetched (qi, ki) schedule, the masked-diagonal / unmasked-interior
    # branches and the multi-step online softmax.
    out = jax.block_until_ready(mod(x, attn_block=8))
    ref = reference_forward(mod, x)

    assert out.shape == (B, S, d_out)
    err = float(jnp.max(jnp.abs(out - ref)))
    # bf16 matmuls (f32 accumulation) + approx reciprocal in the softmax denominator
    assert err < 1e-2, f"mismatch vs reference: max abs err {err}"

    print("KERNEL_OK")
</pallas_src>

<mosaic_0001>
module attributes {stable_mosaic.version = 11 : i64} {
  func.func @_matmul_bias_kernel(%arg0: i32, %arg1: i32, %arg2: i32, %arg3: i32, %arg4: memref<32x32xbf16, #tpu.memory_space<vmem>>, %arg5: memref<1x32x32xbf16, #tpu.memory_space<vmem>>, %arg6: memref<1x1x32xf32, #tpu.memory_space<vmem>>, %arg7: memref<1x32x32xbf16, #tpu.memory_space<vmem>>, %arg8: memref<32x32xf32, #tpu.memory_space<vmem>>) attributes {dimension_semantics = [#tpu.dimension_semantics<parallel>, #tpu.dimension_semantics<parallel>, #tpu.dimension_semantics<parallel>, #tpu.dimension_semantics<arbitrary>], iteration_bounds = array<i64: 3, 1, 1, 1>, scalar_prefetch = 0 : i64, scratch_operands = 1 : i64, tpu.core_type = #tpu.core_type<tc>, window_params = [{transform_indices = @transform_0, window_bounds = array<i64: 32, 32>}, {transform_indices = @transform_1, window_bounds = array<i64: 1, 32, 32>}, {transform_indices = @transform_2, window_bounds = array<i64: 1, 1, 32>}, {transform_indices = @transform_3, window_bounds = array<i64: 1, 32, 32>}]} {
    %c0_i32 = arith.constant 0 : i32
    %0 = arith.cmpi eq, %arg3, %c0_i32 : i32
    %1 = arith.extui %0 : i1 to i32
    %c0_i32_0 = arith.constant 0 : i32
    %2 = arith.cmpi ne, %1, %c0_i32_0 : i32
    scf.if %2 {
      %cst_11 = arith.constant 0.000000e+00 : f32
      %13 = vector.broadcast %cst_11 : f32 to vector<32x32xf32>
      %c0_12 = arith.constant 0 : index
      %c0_13 = arith.constant 0 : index
      %14 = vector.load %arg8[%c0_12, %c0_13] : memref<32x32xf32, #tpu.memory_space<vmem>>, vector<32x32xf32>
      tpu.vector_store %arg8[%c0_12, %c0_13], %13 {strides = array<i32>} : memref<32x32xf32, #tpu.memory_space<vmem>>, vector<32x32xf32>,
    } else {
    }
    %c0 = arith.constant 0 : index
    %c0_1 = arith.constant 0 : index
    %3 = vector.load %arg8[%c0, %c0_1] : memref<32x32xf32, #tpu.memory_space<vmem>>, vector<32x32xf32>
    %c0_2 = arith.constant 0 : index
    %c0_3 = arith.constant 0 : index
    %4 = vector.load %arg4[%c0_2, %c0_3] : memref<32x32xbf16, #tpu.memory_space<vmem>>, vector<32x32xbf16>
    %c0_4 = arith.constant 0 : index
    %c0_5 = arith.constant 0 : index
    %c0_6 = arith.constant 0 : index
    %5 = vector.load %arg5[%c0_4, %c0_5, %c0_6] : memref<1x32x32xbf16, #tpu.memory_space<vmem>>, vector<1x32x32xbf16>
    %6 = vector.shape_cast %5 : vector<1x32x32xbf16> to vector<32x32xbf16>
    %cst = arith.constant dense<0.000000e+00> : vector<32x32xf32>
    %7 = tpu.matmul %4, %6, %cst {dimension_numbers = #tpu.dot_dimension_numbers<[1], [0], [0], [1], [0, 0, 1, 1], [], []>} : vector<32x32xbf16>, vector<32x32xbf16>, vector<32x32xf32> -> vector<32x32xf32>
    %8 = arith.addf %3, %7 : vector<32x32xf32>
    %c0_7 = arith.constant 0 : index
    %c0_8 = arith.constant 0 : index
    %9 = vector.load %arg8[%c0_7, %c0_8] : memref<32x32xf32, #tpu.memory_space<vmem>>, vector<32x32xf32>
    tpu.vector_store %arg8[%c0_7, %c0_8], %8 {strides = array<i32>} : memref<32x32xf32, #tpu.memory_space<vmem>>, vector<32x32xf32>,
    %c0_i32_9 = arith.constant 0 : i32
    %10 = arith.cmpi eq, %arg3, %c0_i32_9 : i32
    %11 = arith.extui %10 : i1 to i32
    %c0_i32_10 = arith.constant 0 : i32
    %12 = arith.cmpi ne, %11, %c0_i32_10 : i32
    scf.if %12 {
      %c0_11 = arith.constant 0 : index
      %c0_12 = arith.constant 0 : index
      %13 = vector.load %arg8[%c0_11, %c0_12] : memref<32x32xf32, #tpu.memory_space<vmem>>, vector<32x32xf32>
      %c0_13 = arith.constant 0 : index
      %c0_14 = arith.constant 0 : index
      %c0_15 = arith.constant 0 : index
      %14 = vector.load %arg6[%c0_13, %c0_14, %c0_15] : memref<1x1x32xf32, #tpu.memory_space<vmem>>, vector<1x1x32xf32>
      %15 = vector.shape_cast %14 : vector<1x1x32xf32> to vector<1x32xf32>
      %16 = vector.broadcast %15 : vector<1x32xf32> to vector<32x32xf32>
      %17 = arith.addf %13, %16 : vector<32x32xf32>
      %18 = arith.truncf %17 : vector<32x32xf32> to vector<32x32xbf16>
      %c0_16 = arith.constant 0 : index
      %c0_17 = arith.constant 0 : index
      %c0_18 = arith.constant 0 : index
      %19 = vector.load %arg7[%c0_16, %c0_17, %c0_18] : memref<1x32x32xbf16, #tpu.memory_space<vmem>>, vector<1x32x32xbf16>
      %20 = vector.shape_cast %19 : vector<1x32x32xbf16> to vector<32x32xbf16>
      %21 = vector.shape_cast %18 : vector<32x32xbf16> to vector<1x32x32xbf16>
      tpu.vector_store %arg7[%c0_16, %c0_17, %c0_18], %21 {strides = array<i32>} : memref<1x32x32xbf16, #tpu.memory_space<vmem>>, vector<1x32x32xbf16>,
    } else {
    }
    return
  }
  func.func @transform_0(%arg0: i32, %arg1: i32, %arg2: i32, %arg3: i32) -> (i32, i32) {
    %c0_i32 = arith.constant 0 : i32
    return %arg1, %arg3 : i32, i32
  }
  func.func @transform_1(%arg0: i32, %arg1: i32, %arg2: i32, %arg3: i32) -> (i32, i32, i32) {
    %c0_i32 = arith.constant 0 : i32
    return %arg0, %arg3, %arg2 : i32, i32, i32
  }
  func.func @transform_2(%arg0: i32, %arg1: i32, %arg2: i32, %arg3: i32) -> (i32, i32, i32) {
    %c0_i32 = arith.constant 0 : i32
    %c0_i32_0 = arith.constant 0 : i32
    return %arg0, %c0_i32, %arg2 : i32, i32, i32
  }
  func.func @transform_3(%arg0: i32, %arg1: i32, %arg2: i32, %arg3: i32) -> (i32, i32, i32) {
    %c0_i32 = arith.constant 0 : i32
    return %arg0, %arg1, %arg2 : i32, i32, i32
  }
}

</mosaic_0001>

<bundles_post_ra>
// kernel: tpu_custom_call.1
= control target key start
LH: loop header
LB: loop body
LE: loop exit
PB: predicated region body
PF: predicated region fallthrough
CT: control target
= control target key end

     0   :  { %8 = vsyncpa [#allocation4], 0  ;;  %s1115_s0 = inlined_call_operand.hbm [shape: bf16[32,32], index: 0, kind: input, shape index: {}]   ;;  %s1116_s1 = inlined_call_operand.hbm [shape: bf16[3,32,32], index: 1, kind: input, shape index: {}]   ;;  %s1117_s2 = inlined_call_operand.vmem [shape: f32[3,1,32], index: 2, kind: input, shape index: {}]   ;;  %s1118_s3 = inlined_call_operand.hbm [shape: bf16[3,32,32], index: 3, kind: output, shape index: {}]  }
   0x1   :  { %9 = vsyncpa [#allocation7], 0 }
   0x2   :  { %11 = vsyncpa [#allocation7 + $0x1], 0 }
   0x3   :  { %12 = vsyncpa [#allocation5], 0 }
   0x4   :  { %14 = vsyncpa [#allocation5 + $0x1], 0  ;;  %s869_s12 = smov 0   ;;  %s871_s13 = smov 0  }
   0x5   :  { %s873_s14 = smov 0   ;;  %s875_s15 = smov 0  }
   0x6   :  { %s877_s16 = smov 0   ;;  %s879_s17 = smov 0  }
   0x7 LB: > { %s567_s18 = sadd.s32 4294967295, %s839_s17   ;;  %s568_s19 = sadd.s32 4294967294, %s839_s17   ;;  %s839_s17 = sphi %s879_s17, %s20_s17   ;;  %s835_s16 = sphi %s877_s16, %s1141_s16   ;;  %s831_s15 = sphi %s875_s15, %s1140_s15   ;;  %s827_s14 = sphi %s873_s14, %s1139_s14   ;;  %s823_s13 = sphi %s871_s13, %s1138_s13   ;;  %s819_s12 = sphi %s869_s12, %s1137_s12  }
   0x8   : > { %p98_p0 = scmp.ne.s32.totalorder %s823_s13, %s819_s12  ;;  %p903_p1 = scmp.eq.s32.totalorder %s567_s18, 0 }
   0x9   : > { %p907_p2 = scmp.eq.s32.totalorder %s567_s18, 2  ;;  %p160_p3 = scmp.eq.s32.totalorder %s568_s19, 2 }
   0xa   : > { %s1123_s20 = scalar_select %p903_p1, 1, 0 }
   0xb   : > { %s1124_s21 = scalar_select %p907_p2, 1, 0 }
   0xc   : > { %p913_p4 = por %p903_p1, %p98_p0  ;;  %p569_p5 = scmp.ge.s32.totalorder %s839_s17, 1 }
   0xd   : > { %p918_p6 = por %p160_p3, %p98_p0  ;;  %p167_p7 = scmp.lt.s32.totalorder %s839_s17, 4 }
   0xe   : > { %s1125_s22 = scalar_select %p913_p4, 1, 0 }
   0xf   : > { %s1126_s23 = scalar_select %p918_p6, 1, 0 }
  0x10   : > { %p923_p8 = pnand %p569_p5, %p167_p7  ;;  %s841_s25 = smov [#allocation3]  }
  0x11   : > { %s183_s26 = sshll.u32 %s841_s25, 4  ;;  %s46_s28 = sadd.s32 1, %s835_s16  ;;  %s184_s26 = int_to_ptr.vmem [resolvable:$true] %s183_s26 }
  0x12   : > { %s1127_s24 = scalar_select %p923_p8, 1, 0 }
  0x13   : > { %p621_p9 = pneg %p923_p8  ;;  %s695_s4 = scalar_lea.hbm %s1115_s0, 256 }
  0x14   : > { %p696_p11 = scmp.ne.s32.totalorder %s1115_s0, %s695_s4  ;;  %p702_p3 = scmp.lt.u32.totalorder %s695_s4, %s1115_s0 }
  0x15   : > { %p931_p10 = pnand %p621_p9, %p903_p1 }
  0x17   : > { %p697_p12 = pneg %p931_p10 }
  0x19   : > { %p698_p13 = pnand %p697_p12, %p696_p11 }
  0x1b   : > { %p699_p0 = pneg %p698_p13 }
  0x1d   : > { %p704_p5 = pnand %p702_p3, %p699_p0 }
  0x1f   : > { %707 = shalt.err (!%p704_p5)
}
  0x20   : > { %s708_s9 = scalar_lea.vmem %s184_s26, 256  ;;  %p716_p4 = scmp.lt.s32.totalorder %s184_s26, %s184_s26 }
  0x21   : > { %p709_p7 = scmp.ne.s32.totalorder %s184_s26, %s708_s9  ;;  %p717_p1 = scmp.lt.s32.totalorder %s708_s9, %s708_s9 }
  0x23   : > { %p711_p9 = pnand %p709_p7, %p697_p12  ;;  %p718_p8 = por %p717_p1, %p716_p4 }
  0x25   : > { %p712_p6 = pneg %p711_p9 }
  0x27   : > { %p719_p2 = pnand %p718_p8, %p712_p6 }
  0x29   : > { %722 = shalt.err (!%p719_p2)
}
  0x2a   : > { %s842_s10 = smov 64   ;;  %s843_s11 = smov 4  }
  0x2b   : > { %624 = dma.hbm_to_vmem [thread:$0]  (!%p931_p10), %s1115_s0, 256, %s184_s26, [#allocation4], %s842_s10, %s842_s10, %s843_s11  }
  0x2c   : > { %p48_p1 = scmp.ge.s32.totalorder %s46_s28, 3  ;;  %s85_s25 = sadd.s32 1, %s827_s14 }
  0x2d   : > { %p92_p2 = scmp.ne.s32.totalorder %s827_s14, %s823_s13  ;;  %p93_p4 = scmp.eq.s32.totalorder %s839_s17, 0 }
  0x2e   : > { %s1143_s28 = smov (%p48_p1, %s46_s28), 0  ;;  %p1130_p8 = scmp.ne.s32.totalorder %s1124_s21, 0 }
  0x2f   : > { %p961_p6 = por %p93_p4, %p92_p2  ;;  %s78_s30 = ssub.s32 %s835_s16, %s1143_s28 }
  0x30   : > { %p967_p11 = por %p1130_p8, %p92_p2  ;;  %p634_p12 = scmp.lt.s32.totalorder %s839_s17, 3 }
  0x31   : > { %p83_p10 = scmp.eq.s32.totalorder %s78_s30, 0  ;;  %s197_s26 = sand.u32 1, %s827_s14  }
  0x32   : > { %s572_s4 = sshll.u32 %s197_s26, 4  ;;  %s595_s6 = sshll.u32 %s835_s16, 8 }
  0x33   : > { %s976_s5 = scalar_select %p83_p10, %s827_s14, %s85_s25  }
  0x34   : > { %s982_s9 = scalar_lea.hbm %s1116_s1, %s595_s6  ;;  %s201_s21 = scalar_lea.vmem [#allocation6], %s572_s4 }
  0x35   : > { %s211_s18 = sshll.u32 %s201_s21, 4  ;;  %p988_p13 = pnand %p634_p12, %p961_p6  ;;  %s984_s18 = int_to_ptr.vmem [resolvable:$true] %s211_s18 }
  0x36   : > { %s992_s25 = scalar_lea.sflag [#allocation7], %s197_s26  ;;  %s723_s30 = scalar_lea.hbm %s982_s9, 256 }
  0x37   : > { %p724_p0 = scmp.ne.s32.totalorder %s982_s9, %s723_s30  ;;  %p725_p3 = pneg %p988_p13 }
  0x38   : > { %s728_s29 = scalar_lea.hbm %s1116_s1, 768  ;;  %p729_p9 = scmp.lt.u32.totalorder %s982_s9, %s1116_s1 }
  0x39   : > { %p726_p5 = pnand %p725_p3, %p724_p0  ;;  %p730_p1 = scmp.lt.u32.totalorder %s728_s29, %s723_s30 }
  0x3a   : > { %p732_p4 = scmp.lt.u32.totalorder %s723_s30, %s982_s9 }
  0x3b   : > { %p727_p7 = pneg %p726_p5  ;;  %p731_p2 = por %p730_p1, %p729_p9 }
  0x3d   : > { %p733_p6 = por %p732_p4, %p731_p2 }
  0x3f   : > { %p734_p8 = pnand %p733_p6, %p727_p7 }
  0x41   : > { %737 = shalt.err (!%p734_p8)
}
  0x42   : > { %s738_s26 = scalar_lea.vmem %s984_s18, 256  ;;  %s844_s21 = smov [#allocation6]  }
  0x43   : > { %p739_p12 = scmp.ne.s32.totalorder %s984_s18, %s738_s26  ;;  %s743_s4 = sshll.u32 %s844_s21, 4  ;;  %s744_s4 = int_to_ptr.vmem [resolvable:$false] %s743_s4 }
  0x44   : > { %s745_s6 = scalar_lea.vmem %s744_s4, 512  ;;  %p746_p5 = scmp.lt.s32.totalorder %s984_s18, %s744_s4 }
  0x45   : > { %p741_p10 = pnand %p739_p12, %p725_p3  ;;  %p747_p9 = scmp.lt.s32.totalorder %s745_s6, %s738_s26 }
  0x47   : > { %p742_p0 = pneg %p741_p10  ;;  %p748_p1 = por %p747_p9, %p746_p5 }
  0x49   : > { %p749_p2 = pnand %p748_p1, %p742_p0 }
  0x4b   : > { %752 = shalt.err (!%p749_p2)
}
  0x4c   : > { %628 = dma.hbm_to_vmem [thread:$0]  (!%p988_p13), %s982_s9, 256, %s984_s18, %s992_s25, %s842_s10, %s842_s10, %s843_s11  }
  0x4d   : > { %p1133_p3 = scmp.ne.s32.totalorder %s1127_s24, 0 }
  0x4e   : > { %p1134_p7 = scmp.ne.s32.totalorder (!%p1133_p3), %s1123_s20, 0 }
  0x4f   : > { %232 = sbr.rel (%p1133_p3) target bundleno = 344 (0x158), region = 32 }
  0x56   : > { %806 = dma.done.wait (%p1134_p7), [#allocation4], 256  }
  0x57   : > { %808 = vsyncadd (%p1134_p7), [#allocation4], 4294967040  ;;  %s1030_s30 = sand.u32 1, %s823_s13   ;;  %p1135_p13 = scmp.ne.s32.totalorder %s1125_s22, 0 }
  0x58   : > { %s577_s19 = sshll.u32 %s1030_s30, 4  ;;  %s239_s29 = scalar_lea.sflag [#allocation7], %s1030_s30 }
  0x59   : > { %s242_s10 = scalar_lea.vmem [#allocation6], %s577_s19 }
  0x5a   : > { %810 = dma.done.wait (%p1135_p13), %s239_s29, 256  }
  0x5b   : > { %812 = vsyncadd (%p1135_p13), %s239_s29, 4294967040  ;;  %vm285_vm0 = vcmask 261120   ;;  %v845_v0 = vmov 0.0   ;;  %v691_v1 = vld [vmem:[%s242_s10] sm:$0xff]   ;;  %v692_v2 = vld [vmem:[%s242_s10 + $0x8] sm:$0xff]   ;;  %p273_p4 = scmp.lt.s32.totalorder %s831_s15, 2 }
  0x5c   : > { %288 = vst.msk [vmem:[#allocation2 + $0x10] sm:$0xff] %vm285_vm0, %v845_v0  ;;  %286 = vst.msk [vmem:[#allocation2] sm:$0xff] %vm285_vm0, %v845_v0  ;;  %605 = vmatprep.subr.bf16.mxu0 %v691_v1  ;;  %v693_v3 = vld [vmem:[#allocation3] sm:$0xff]   ;;  %v694_v4 = vld [vmem:[#allocation3 + $0x8] sm:$0xff]   ;;  %vm422_vm1 = vcmask 257024   ;;  %s600_s9 = sshll.u32 %s831_s15, 8 }
  0x5d   : > { %287 = vst.msk [vmem:[#allocation2 + $0x8] sm:$0xff] %vm285_vm0, %v845_v0  ;;  %289 = vst.msk [vmem:[#allocation2 + $0x18] sm:$0xff] %vm285_vm0, %v845_v0  ;;  %606 = vmatpush3.bf16.msra.mxu0 %v691_v1  ;;  %609 = vmatprep.mubr.msk.bf16.mxu0 %vm285_vm0, %v693_v3  ;;  %s274_s20 = scalar_select %p273_p4, %s831_s15, 2 }
  0x5e   : > { %607 = vmatprep.subr.bf16.mxu0 %v692_v2  ;;  %s270_s18 = scalar_lea.vmem [#allocation8], %s577_s19  ;;  %s1062_s26 = scalar_lea.hbm %s1118_s3, %s600_s9 }
  0x5f   : > { %s278_s11 = scalar_lea.vmem %s1117_s2, %s274_s20  ;;  %s444_s25 = sshll.u32 %s270_s18, 4  ;;  %s1064_s25 = int_to_ptr.vmem [resolvable:$true] %s444_s25 }
  0x60   : > { %v585_v17 = vld [vmem:[%s278_s11] ss:$0 sm:$0xff]  ;;  %s428_s15 = scalar_lea.sflag [#allocation5], %s1030_s30  ;;  %s753_s21 = scalar_lea.vmem %s1064_s25, 256 }
  0x61   : > { %608 = vmatpush3.bf16.msra.mxu0 %v692_v2  ;;  %p754_p6 = scmp.ne.s32.totalorder %s1064_s25, %s753_s21  ;;  %s846_s4 = smov [#allocation8]  }
  0x62   : > { %s757_s6 = sshll.u32 %s846_s4, 4  ;;  %s758_s6 = int_to_ptr.vmem [resolvable:$false] %s757_s6 }
  0x63   : > { %v292_v5 = vld [vmem:[#allocation2 + $0x10] sm:$0xff]  ;;  %v290_v6 = vld [vmem:[#allocation2] sm:$0xff]  ;;  %p755_p8 = pnand %p754_p6, %p967_p11  ;;  %s759_s19 = scalar_lea.vmem %s758_s6, 512 }
  0x64   : > { %610 = vmatmul.mubr.msk.bf16.vlgmr.msra.gmra.mrb[0].mxu0 %vm285_vm0, %v694_v4  ;;  %v293_v8 = vld [vmem:[#allocation2 + $0x18] sm:$0xff]  ;;  %v291_v11 = vld [vmem:[#allocation2 + $0x8] sm:$0xff]  ;;  %p760_p10 = scmp.lt.s32.totalorder %s1064_s25, %s758_s6  ;;  %p761_p0 = scmp.lt.s32.totalorder %s759_s19, %s753_s21 }
  0x65   : > { %p756_p12 = pneg %p755_p8 }
  0x66   : > { %p762_p5 = por %p761_p0, %p760_p10 }
  0x68   : > { %p763_p9 = pnand %p762_p5, %p756_p12 }
 0x137   : > { %v611_v7 = vpop.f32.mrb[0].mxu0 }
 0x138   : > { %v382_v9 = vadd.f32 %v611_v7, %v292_v5  ;;  %v365_v10 = vpop.f32.mrb[1].mxu0 }
 0x139   : > { %v380_v12 = vadd.f32 %v365_v10, %v290_v6  ;;  %v612_v13 = vpop.f32.mrb[2].mxu0 }
 0x13a   : > { %386 = vst.msk [vmem:[#allocation2 + $0x10] sm:$0xff] %vm285_vm0, %v382_v9  ;;  %v383_v14 = vadd.f32 %v612_v13, %v293_v8  ;;  %v368_v15 = vpop.f32.mrb[3].mxu0 }
 0x13b   : > { %384 = vst.msk [vmem:[#allocation2] sm:$0xff] %vm285_vm0, %v380_v12  ;;  %v381_v16 = vadd.f32 %v368_v15, %v291_v11 }
 0x13c   : > { %387 = vst.msk [vmem:[#allocation2 + $0x18] sm:$0xff] %vm285_vm0, %v383_v14 }
 0x13d   : > { %385 = vst.msk [vmem:[#allocation2 + $0x8] sm:$0xff] %vm285_vm0, %v381_v16 }
 0x141   : > { %v393_v18 = vld [vmem:[#allocation2 + $0x10] sm:$0xff] }
 0x142   : > { %v391_v19 = vld [vmem:[#allocation2] sm:$0xff]  ;;  %v404_v20 = vadd.f32 %v585_v17, %v393_v18 }
 0x143   : > { %v394_v21 = vld [vmem:[#allocation2 + $0x18] sm:$0xff]  ;;  %v402_v22 = vadd.f32 %v585_v17, %v391_v19 }
 0x144   : > { %v392_v23 = vld [vmem:[#allocation2 + $0x8] sm:$0xff]  ;;  %v405_v24 = vadd.f32 %v585_v17, %v394_v21  ;;  %v598_v25 = vpack.c.bf16 %v404_v20, %v404_v20 }
 0x145   : > { %v403_v26 = vadd.f32 %v585_v17, %v392_v23  ;;  %v596_v27 = vpack.c.bf16 %v402_v22, %v402_v22 }
 0x146   : > { %v599_v28 = vpack.c.bf16 %v405_v24, %v405_v24  ;;  %425 = vst.msk [vmem:[%s270_s18 + $0x8] sm:$0xf] %vm422_vm1, %v598_v25 }
 0x147   : > { %v597_v29 = vpack.c.bf16 %v403_v26, %v403_v26  ;;  %423 = vst.msk [vmem:[%s270_s18] sm:$0xf] %vm422_vm1, %v596_v27 }
 0x148   : > { %426 = vst.msk [vmem:[%s270_s18 + $0xc] sm:$0xf] %vm422_vm1, %v599_v28 }
 0x149   : > { %424 = vst.msk [vmem:[%s270_s18 + $0x4] sm:$0xf] %vm422_vm1, %v597_v29 }
 0x14a   : > { %766 = shalt.err (!%p763_p9)
}
 0x14b   : > { %s767_s29 = scalar_lea.hbm %s1062_s26, 256  ;;  %s771_s22 = scalar_lea.hbm %s1118_s3, 768 }
 0x14c   : > { %p768_p1 = scmp.ne.s32.totalorder %s1062_s26, %s767_s29  ;;  %p772_p7 = scmp.lt.u32.totalorder %s1062_s26, %s1118_s3 }
 0x14d   : > { %p773_p13 = scmp.lt.u32.totalorder %s771_s22, %s767_s29  ;;  %p775_p6 = scmp.lt.u32.totalorder %s767_s29, %s1062_s26 }
 0x14e   : > { %p769_p2 = pnand %p768_p1, %p967_p11 }
 0x14f   : > { %p774_p4 = por %p773_p13, %p772_p7 }
 0x150   : > { %p770_p3 = pneg %p769_p2 }
 0x151   : > { %p776_p8 = por %p775_p6, %p774_p4 }
 0x153   : > { %p777_p12 = pnand %p776_p8, %p770_p3 }
 0x155   : > { %780 = shalt.err (!%p777_p12)
}
 0x156   : > { %s847_s9 = smov 64   ;;  %s848_s18 = smov 4  }
 0x157   : > { %619 = dma.vmem_to_hbm [thread:$0]  (%p967_p11), %s1064_s25, 256, %s1062_s26, %s428_s15, %s847_s9, %s847_s9, %s848_s18  }
 0x158 PF: > { %p636_p10 = scmp.ge.s32.totalorder %s839_s17, 2  ;;  %s459_s7 = sand.u32 1, %s819_s12  }
 0x159   : > { %p1136_p0 = scmp.ne.s32.totalorder %s1126_s23, 0  ;;  %s460_s8 = scalar_lea.sflag [#allocation5], %s459_s7 }
 0x15b   : > { %p630_p5 = pnand %p636_p10, %p1136_p0 }
 0x15d   : > { %814 = dma.done.wait (!%p630_p5), %s460_s8, 256  }
 0x15e   : > { %816 = vsyncadd (!%p630_p5), %s460_s8, 4294967040  ;;  %s20_s17 = sadd.s32 1, %s839_s17   ;;  %s1137_s12 = smov %s823_s13 }
 0x15f   : > { %p17_p9 = scmp.ge.s32.totalorder %s20_s17, 5   ;;  %s1138_s13 = smov %s827_s14 }
 0x160   : > { %s1139_s14 = smov %s976_s5  ;;  %s1140_s15 = smov %s835_s16 }
 0x161   : > { %s1141_s16 = smov %s1143_s28  ;;  %19 = sbr.rel (!%p17_p9) target bundleno = 7 (0x7), region = 94 }
 0x168   :  { %465 = vsyncpa [#allocation4], 1 }
 0x169   :  { %467 = vsyncpa [#allocation4 + $0x1], 1 }
 0x16a   :  { %468 = vsyncpa [#allocation7], 1 }
 0x16b   :  { %470 = vsyncpa [#allocation7 + $0x1], 1 }
 0x16c   :  { %471 = vsyncpa [#allocation5], 1 }
 0x16d   :  { %473 = vsyncpa [#allocation5 + $0x1], 1 }

</bundles_post_ra>
